<compile_context>
chip_gen: v7x
topology: tpu7x:2x2x1
jax: 0.10.0
libtpu: 0.0.40
codegen_flags: <defaults>
</compile_context>

<pallas_src>
from functools import partial

import jax
import jax.numpy as jnp
from jax.experimental import pallas as pl
from jax.experimental.pallas import tpu as pltpu

NUM_MODELS = 14
# 0*o1 + 5*o2 + 10*o3 + 10*o4 + 1*o5 + 5*o6 + 2*o7 + 5*o8   (o9..o14 unused)
ENSEMBLE_W = (0.0, 5.0, 10.0, 10.0, 1.0, 5.0, 2.0, 5.0,
              0.0, 0.0, 0.0, 0.0, 0.0, 0.0)

LANE = 128
SUBLANE = 8
MAX_TILE = 512          # large-batch tile (amortizes per-step overhead)


def _round_up(n, m):
    return ((n + m - 1) // m) * m


# --------------------------------------------------------------------------
# Kernel: one fused matmul + bias add per batch tile.
# --------------------------------------------------------------------------
def _ensemble_kernel(x_ref, w_ref, b_ref, out_ref):
    """x_ref  : VMEM [bt, Dp]  bf16  feature tile (batch on sublanes)
       w_ref  : VMEM [Dp, P]   bf16  14 heads + folded-ensemble head, packed
       b_ref  : VMEM [1, P]    f32   packed biases (incl. folded-ensemble bias)
       out_ref: VMEM [bt, P]   f32   lane-dense packed logits
    """
    out_ref[...] = jnp.dot(x_ref[...], w_ref[...],
                           preferred_element_type=jnp.float32) + b_ref[...]


def ensemble_pallas(x, w_packed, b_packed):
    """x: [B, D] f32 (unpadded), w_packed: [Dp, P] bf16, b_packed: [1, P] f32.

    Returns out_all [B, P] f32: columns [m*K:(m+1)*K] are model m's logits,
    columns [14*K:15*K] are the weighted ensemble output.
    """
    B, D = x.shape
    Dp, P = w_packed.shape

    # --- batch tiling ------------------------------------------------------
    if B <= SUBLANE:
        # Tiny batch: one sublane-aligned tile.
        Bp = SUBLANE
        bt = Bp
    elif B <= 2 * MAX_TILE:
        # Two half-batch tiles -> 2 "parallel" steps so both v7x TensorCores
        # get work (no effect on v5e / v6e, which have a single core).
        Bp = _round_up(B, 2 * SUBLANE)
        bt = Bp // 2
    else:
        bt = MAX_TILE
        Bp = _round_up(B, bt)
    grid = (Bp // bt,)

    # Pad + cast x (fuses with the surrounding jit into a single HBM pass).
    x_p = jnp.pad(x, ((0, Bp - B), (0, Dp - D))).astype(jnp.bfloat16)

    flops = 2 * Bp * Dp * P
    bytes_accessed = Bp * Dp * 2 + Dp * P * 2 + P * 4 + Bp * P * 4

    out_all = pl.pallas_call(
        _ensemble_kernel,
        grid=grid,
        in_specs=[
            pl.BlockSpec((bt, Dp), lambda i: (i, 0)),   # X batch tile
            pl.BlockSpec((Dp, P), lambda i: (0, 0)),    # packed weights (resident)
            pl.BlockSpec((1, P), lambda i: (0, 0)),     # packed biases (resident)
        ],
        out_specs=pl.BlockSpec((bt, P), lambda i: (i, 0)),
        out_shape=jax.ShapeDtypeStruct((Bp, P), jnp.float32),
        compiler_params=pltpu.CompilerParams(
            dimension_semantics=("parallel",)),
        cost_estimate=pl.CostEstimate(flops=flops, transcendentals=0,
                                      bytes_accessed=bytes_accessed),
    )(x_p, w_packed, b_packed)

    return out_all[:B]


# --------------------------------------------------------------------------
# One-time parameter packing (hoisted out of the per-call path).
# --------------------------------------------------------------------------
def pack_params(w_stack, b_stack):
    """w_stack: [14, D, K] f32, b_stack: [14, 1, K] f32 ->
       (w_packed [Dp, P] bf16, b_packed [1, P] f32) with the folded ensemble
       head occupying columns [14*K : 15*K)."""
    M, D, K = w_stack.shape
    assert M == NUM_MODELS
    P = _round_up(M * K + K, LANE)            # 112 + 8 -> 128
    Dp = _round_up(D, LANE)                   # 1120 -> 1152

    ens_w = jnp.asarray(ENSEMBLE_W, jnp.float32)

    w_cat = jnp.transpose(w_stack, (1, 0, 2)).reshape(D, M * K)      # [D, 112]
    w_ens = jnp.einsum("m,mdk->dk", ens_w, w_stack)                  # [D, 8]
    w_full = jnp.concatenate([w_cat, w_ens], axis=1)                 # [D, 120]
    w_full = jnp.pad(w_full, ((0, Dp - D), (0, P - (M * K + K)))
                     ).astype(jnp.bfloat16)

    b_flat = b_stack.reshape(M, K)
    b_cat = b_flat.reshape(1, M * K)
    b_ens = jnp.einsum("m,mk->k", ens_w, b_flat)[None, :]
    b_full = jnp.concatenate([b_cat, b_ens], axis=1).astype(jnp.float32)
    b_full = jnp.pad(b_full, ((0, 0), (0, P - (M * K + K))))
    return w_full, b_full


def make_params(key, d_img, d_mtcnn, d_aligned, num_classes):
    """Deterministic synthetic weights for the 14 linear heads, with
    zero-masked rows for inputs each sub-model does not receive."""
    D = d_img + d_mtcnn + d_aligned
    kw, kb = jax.random.split(key)
    w = jax.random.normal(kw, (NUM_MODELS, D, num_classes), jnp.float32) * 0.02
    b = jax.random.normal(kb, (NUM_MODELS, 1, num_classes), jnp.float32) * 0.01

    # Per-model input usage (1-indexed as in the PyTorch forward):
    #  1,2      : image only
    #  3,4,9,10 : aligned face features only
    #  5        : image + mtcnn face features
    #  6,7,8,11,12,13,14 : image + aligned face features
    img_s = slice(0, d_img)
    mtc_s = slice(d_img, d_img + d_mtcnn)
    alg_s = slice(d_img + d_mtcnn, D)

    def mask_for(uses_img, uses_mtcnn, uses_aligned):
        m = jnp.zeros((D,), jnp.float32)
        if uses_img:
            m = m.at[img_s].set(1.0)
        if uses_mtcnn:
            m = m.at[mtc_s].set(1.0)
        if uses_aligned:
            m = m.at[alg_s].set(1.0)
        return m

    usage = [
        (True, False, False),   # 1
        (True, False, False),   # 2
        (False, False, True),   # 3
        (False, False, True),   # 4
        (True, True, False),    # 5
        (True, False, True),    # 6
        (True, False, True),    # 7
        (True, False, True),    # 8
        (False, False, True),   # 9
        (False, False, True),   # 10
        (True, False, True),    # 11
        (True, False, True),    # 12
        (True, False, True),    # 13
        (True, False, True),    # 14
    ]
    masks = jnp.stack([mask_for(*u) for u in usage])          # [14, D]
    w = w * masks[:, :, None]
    return w, b


# --------------------------------------------------------------------------
# Forward (mirrors Ensemble.forward -> 15-tuple).
# --------------------------------------------------------------------------
@partial(jax.jit, static_argnames=("num_classes",))
def _ensemble_forward_jit(image, face_features_mtcnn, face_features_aligned,
                          w_packed, b_packed, num_classes):
    B = image.shape[0]
    x = jnp.concatenate(
        [image.reshape(B, -1).astype(jnp.float32),
         face_features_mtcnn.astype(jnp.float32),
         face_features_aligned.astype(jnp.float32)], axis=1)
    out_all = ensemble_pallas(x, w_packed, b_packed)
    K = num_classes
    per_model = tuple(out_all[:, i * K:(i + 1) * K] for i in range(NUM_MODELS))
    out_ens = out_all[:, NUM_MODELS * K:NUM_MODELS * K + K]
    return (out_ens,) + per_model


def ensemble_forward(image, labels, face_features_mtcnn, face_features_aligned,
                     numberFaces, phase, w_packed, b_packed, num_classes):
    """Mirrors Ensemble.forward -> (output, output1..output14)."""
    # TODO(synk): labels / numberFaces / phase drive the opaque sub-models'
    # internal attention/pooling in the original; the synthetic linear heads
    # here do not consume them.
    del labels, numberFaces, phase
    return _ensemble_forward_jit(image, face_features_mtcnn,
                                 face_features_aligned, w_packed, b_packed,
                                 num_classes)


if __name__ == "__main__":
    B, C, H, W = 8, 4, 16, 16
    D_MTCNN, D_ALIGNED, K = 32, 64, 8

    key = jax.random.PRNGKey(0)
    k_img, k_mtc, k_alg, k_lab, k_nf, k_par = jax.random.split(key, 6)

    image = jax.random.normal(k_img, (B, C, H, W), jnp.float32)      # NCHW
    face_features_mtcnn = jax.random.normal(k_mtc, (B, D_MTCNN), jnp.float32)
    face_features_aligned = jax.random.normal(k_alg, (B, D_ALIGNED), jnp.float32)
    labels = jax.random.randint(k_lab, (B,), 0, K)
    numberFaces = jax.random.randint(k_nf, (B,), 1, 10)
    phase = "train"

    w_stack, b_stack = make_params(k_par, C * H * W, D_MTCNN, D_ALIGNED, K)
    w_packed, b_packed = pack_params(w_stack, b_stack)   # one-time packing

    outs = ensemble_forward(image, labels, face_features_mtcnn,
                            face_features_aligned, numberFaces, phase,
                            w_packed, b_packed, K)
    outs = jax.block_until_ready(outs)

    # ---- cross-check against plain JAX ----
    # The kernel uses bf16 operands with f32 accumulation, so the reference
    # uses the same bf16 casts for the per-model heads.
    x = jnp.concatenate([image.reshape(B, -1), face_features_mtcnn,
                         face_features_aligned], axis=1)
    ref_all = jnp.einsum("bd,mdk->mbk",
                         x.astype(jnp.bfloat16), w_stack.astype(jnp.bfloat16),
                         preferred_element_type=jnp.float32) + b_stack
    ref_ens = jnp.sum(jnp.asarray(ENSEMBLE_W, jnp.float32)[:, None, None]
                      * ref_all, axis=0)

    for i in range(NUM_MODELS):
        assert jnp.allclose(outs[1 + i], ref_all[i], atol=5e-3, rtol=1e-3), i
    # Ensemble tolerance is looser: the folded ensemble weight columns
    # (scaled by up to 10x) are rounded to bf16 before the matmul, whereas
    # the reference sums f32 logits.
    assert jnp.allclose(outs[0], ref_ens, atol=2e-1, rtol=2e-2)

    print("KERNEL_OK")
</pallas_src>

<mosaic_0001>
module attributes {stable_mosaic.version = 11 : i64} {
  func.func @_ensemble_kernel(%arg0: i32, %arg1: memref<8x1152xbf16, #tpu.memory_space<vmem>>, %arg2: memref<1152x128xbf16, #tpu.memory_space<vmem>>, %arg3: memref<1x128xf32, #tpu.memory_space<vmem>>, %arg4: memref<8x128xf32, #tpu.memory_space<vmem>>) attributes {dimension_semantics = [#tpu.dimension_semantics<parallel>], iteration_bounds = array<i64: 1>, scalar_prefetch = 0 : i64, scratch_operands = 0 : i64, tpu.core_type = #tpu.core_type<tc>, window_params = [{transform_indices = @transform_0, window_bounds = array<i64: 8, 1152>}, {pipeline_mode = #tpu.pipeline_mode<synchronous>, transform_indices = @transform_1, window_bounds = array<i64: 1152, 128>}, {pipeline_mode = #tpu.pipeline_mode<synchronous>, transform_indices = @transform_2, window_bounds = array<i64: 1, 128>}, {transform_indices = @transform_3, window_bounds = array<i64: 8, 128>}]} {
    %c0 = arith.constant 0 : index
    %c0_0 = arith.constant 0 : index
    %0 = vector.load %arg1[%c0, %c0_0] : memref<8x1152xbf16, #tpu.memory_space<vmem>>, vector<8x1152xbf16>
    %c0_1 = arith.constant 0 : index
    %c0_2 = arith.constant 0 : index
    %1 = vector.load %arg2[%c0_1, %c0_2] : memref<1152x128xbf16, #tpu.memory_space<vmem>>, vector<1152x128xbf16>
    %cst = arith.constant dense<0.000000e+00> : vector<8x128xf32>
    %2 = tpu.matmul %0, %1, %cst {dimension_numbers = #tpu.dot_dimension_numbers<[1], [0], [0], [1], [0, 0, 1, 1], [], []>} : vector<8x1152xbf16>, vector<1152x128xbf16>, vector<8x128xf32> -> vector<8x128xf32>
    %c0_3 = arith.constant 0 : index
    %c0_4 = arith.constant 0 : index
    %3 = vector.load %arg3[%c0_3, %c0_4] : memref<1x128xf32, #tpu.memory_space<vmem>>, vector<1x128xf32>
    %4 = vector.broadcast %3 : vector<1x128xf32> to vector<8x128xf32>
    %5 = arith.addf %2, %4 : vector<8x128xf32>
    %c0_5 = arith.constant 0 : index
    %c0_6 = arith.constant 0 : index
    %6 = vector.load %arg4[%c0_5, %c0_6] : memref<8x128xf32, #tpu.memory_space<vmem>>, vector<8x128xf32>
    tpu.vector_store %arg4[%c0_5, %c0_6], %5 {strides = array<i32>} : memref<8x128xf32, #tpu.memory_space<vmem>>, vector<8x128xf32>,
    return
  }
  func.func @transform_0(%arg0: i32) -> (i32, i32) {
    %c0_i32 = arith.constant 0 : i32
    %c0_i32_0 = arith.constant 0 : i32
    return %arg0, %c0_i32 : i32, i32
  }
  func.func @transform_1(%arg0: i32) -> (i32, i32) {
    %c0_i32 = arith.constant 0 : i32
    %c0_i32_0 = arith.constant 0 : i32
    %c0_i32_1 = arith.constant 0 : i32
    return %c0_i32, %c0_i32_0 : i32, i32
  }
  func.func @transform_2(%arg0: i32) -> (i32, i32) {
    %c0_i32 = arith.constant 0 : i32
    %c0_i32_0 = arith.constant 0 : i32
    %c0_i32_1 = arith.constant 0 : i32
    return %c0_i32, %c0_i32_0 : i32, i32
  }
  func.func @transform_3(%arg0: i32) -> (i32, i32) {
    %c0_i32 = arith.constant 0 : i32
    %c0_i32_0 = arith.constant 0 : i32
    return %arg0, %c0_i32 : i32, i32
  }
}

</mosaic_0001>

<bundles_post_ra>
// kernel: _ensemble_forward_jit.1
= control target key start
LH: loop header
LB: loop body
LE: loop exit
PB: predicated region body
PF: predicated region fallthrough
CT: control target
= control target key end

     0   :  { %vm1123_vm0 = vmmov 0   ;;  %s1381_s1 = inlined_call_operand.vmem [shape: bf16[1152,128], index: 1, kind: input, shape index: {}]   ;;  %s1382_s0 = inlined_call_operand.vmem [shape: bf16[8,1152], index: 0, kind: input, shape index: {}]   ;;  %s1383_s2 = inlined_call_operand.vmem [shape: f32[1,128], index: 2, kind: input, shape index: {}]   ;;  %s1384_s3 = inlined_call_operand.vmem [shape: f32[8,128], index: 3, kind: output, shape index: {}]  }
   0x1   :  { %v1041_v0 = vld [vmem:[%s1381_s1 + $0x40] sm:$0xff]   ;;  %v1045_v4 = vld [vmem:[%s1381_s1 + $0x48] sm:$0xff]   ;;  %v1049_v8 = vld [vmem:[%s1381_s1 + $0x50] sm:$0xff]  }
   0x2   :  { %v1042_v1 = vld [vmem:[%s1381_s1] sm:$0xff]   ;;  %922 = vmatprep.subr.bf16.mxu0 %v1041_v0  ;;  %v1046_v5 = vld [vmem:[%s1381_s1 + $0x8] sm:$0xff]   ;;  %v1050_v9 = vld [vmem:[%s1381_s1 + $0x10] sm:$0xff]  }
   0x3   :  { %v1043_v2 = vld [vmem:[%s1381_s1 + $0xc0] sm:$0xff]   ;;  %923 = vmatpush3.bf16.msra.mxu0 %v1042_v1  ;;  %v1047_v6 = vld [vmem:[%s1381_s1 + $0xc8] sm:$0xff]   ;;  %v1051_v10 = vld [vmem:[%s1381_s1 + $0xd0] sm:$0xff]  }
   0x4   :  { %v1044_v3 = vld [vmem:[%s1381_s1 + $0x80] sm:$0xff]   ;;  %944 = vmatprep.subr.bf16.mxu1 %v1043_v2  ;;  %924 = vmatprep.subr.bf16.mxu0 %v1045_v4  ;;  %v1048_v7 = vld [vmem:[%s1381_s1 + $0x88] sm:$0xff]   ;;  %v1052_v11 = vld [vmem:[%s1381_s1 + $0x90] sm:$0xff]  }
   0x5   :  { %945 = vmatpush3.bf16.msra.mxu1 %v1044_v3  ;;  %v1053_v12 = vld [vmem:[%s1381_s1 + $0x58] sm:$0xff]   ;;  %v1057_v16 = vld [vmem:[%s1381_s1 + $0x60] sm:$0xff]   ;;  %v1061_v20 = vld [vmem:[%s1381_s1 + $0x68] sm:$0xff]  }
   0x6   :  { %946 = vmatprep.subr.bf16.mxu1 %v1047_v6  ;;  %v1054_v13 = vld [vmem:[%s1381_s1 + $0x18] sm:$0xff]   ;;  %v1058_v17 = vld [vmem:[%s1381_s1 + $0x20] sm:$0xff]   ;;  %v1062_v21 = vld [vmem:[%s1381_s1 + $0x28] sm:$0xff]  }
   0x7   :  { %925 = vmatpush3.bf16.msra.mxu0 %v1046_v5  ;;  %v1055_v14 = vld [vmem:[%s1381_s1 + $0xd8] sm:$0xff]   ;;  %v1059_v18 = vld [vmem:[%s1381_s1 + $0xe0] sm:$0xff]   ;;  %v1063_v22 = vld [vmem:[%s1381_s1 + $0xe8] sm:$0xff]  }
   0x8   :  { %926 = vmatprep.subr.bf16.mxu0 %v1049_v8  ;;  %v1056_v15 = vld [vmem:[%s1381_s1 + $0x98] sm:$0xff]   ;;  %v1060_v19 = vld [vmem:[%s1381_s1 + $0xa0] sm:$0xff]   ;;  %v1064_v23 = vld [vmem:[%s1381_s1 + $0xa8] sm:$0xff]  }
   0x9   :  { %947 = vmatpush3.bf16.msra.mxu1 %v1048_v7  ;;  %v1065_v24 = vld [vmem:[%s1381_s1 + $0x70] sm:$0xff]   ;;  %v1069_v28 = vld [vmem:[%s1381_s1 + $0x78] sm:$0xff]   ;;  %v15_v31 = vld [vmem:[%s1382_s0] sm:$0xff] }
   0xa   :  { %948 = vmatprep.subr.bf16.mxu1 %v1051_v10  ;;  %v1066_v25 = vld [vmem:[%s1381_s1 + $0x30] sm:$0xff]   ;;  %v1070_v29 = vld [vmem:[%s1381_s1 + $0x38] sm:$0xff]   ;;  %v841_v32 = vcombine.low %v15_v31, %v15_v31  ;;  %v842_v33 = vcombine.high %v15_v31, %v15_v31  ;;  %v1075_v35 = vld [vmem:[%s1381_s1 + $0x140] sm:$0xff]  }
   0xb   :  { %927 = vmatpush3.bf16.msra.mxu0 %v1050_v9  ;;  %v1067_v26 = vld [vmem:[%s1381_s1 + $0xf0] sm:$0xff]   ;;  %v1071_v30 = vld [vmem:[%s1381_s1 + $0xf8] sm:$0xff]   ;;  %v16_v36 = vld [vmem:[%s1382_s0 + $0x8] sm:$0xff]  ;;  %v1122_v9 = vmov 0.0  }
   0xc   :  { %928 = vmatprep.subr.bf16.mxu0 %v1053_v12  ;;  %v1068_v27 = vld [vmem:[%s1381_s1 + $0xb0] sm:$0xff]   ;;  %v1074_v34 = vld [vmem:[%s1381_s1 + $0xb8] sm:$0xff]   ;;  %667 = vmatprep.mubr.bf16.mxu0 %v842_v33  ;;  %v843_v37 = vcombine.low %v16_v36, %v16_v36  ;;  %v844_v38 = vcombine.high %v16_v36, %v16_v36  ;;  %v1078_v39 = vld [vmem:[%s1381_s1 + $0x100] sm:$0xff]  }
   0xd   :  { %949 = vmatpush3.bf16.msra.mxu1 %v1052_v11  ;;  %v1079_v40 = vld [vmem:[%s1381_s1 + $0x1c0] sm:$0xff]   ;;  %v1081_v42 = vld [vmem:[%s1381_s1 + $0x148] sm:$0xff]   ;;  %v1085_v46 = vld [vmem:[%s1381_s1 + $0x150] sm:$0xff]  }
   0xe   :  { %950 = vmatprep.subr.bf16.mxu1 %v1055_v14  ;;  %707 = vmatprep.mubr.bf16.mxu1 %v844_v38  ;;  %v1080_v41 = vld [vmem:[%s1381_s1 + $0x180] sm:$0xff]   ;;  %v1082_v43 = vld [vmem:[%s1381_s1 + $0x108] sm:$0xff]   ;;  %v1086_v47 = vld [vmem:[%s1381_s1 + $0x110] sm:$0xff]  }
   0xf   :  { %929 = vmatpush3.bf16.msra.mxu0 %v1054_v13  ;;  %v1083_v44 = vld [vmem:[%s1381_s1 + $0x1c8] sm:$0xff]   ;;  %v1087_v48 = vld [vmem:[%s1381_s1 + $0x1d0] sm:$0xff]   ;;  %v1089_v50 = vld [vmem:[%s1381_s1 + $0x158] sm:$0xff]  }
  0x10   :  { %930 = vmatprep.subr.bf16.mxu0 %v1057_v16  ;;  %v1084_v45 = vld [vmem:[%s1381_s1 + $0x188] sm:$0xff]   ;;  %v1088_v49 = vld [vmem:[%s1381_s1 + $0x190] sm:$0xff]   ;;  %v1090_v51 = vld [vmem:[%s1381_s1 + $0x118] sm:$0xff]  }
  0x11   :  { %951 = vmatpush3.bf16.msra.mxu1 %v1056_v15  ;;  %v1091_v52 = vld [vmem:[%s1381_s1 + $0x1d8] sm:$0xff]   ;;  %v1093_v54 = vld [vmem:[%s1381_s1 + $0x160] sm:$0xff]   ;;  %v1097_v58 = vld [vmem:[%s1381_s1 + $0x168] sm:$0xff]  }
  0x12   :  { %952 = vmatprep.subr.bf16.mxu1 %v1059_v18  ;;  %v1092_v53 = vld [vmem:[%s1381_s1 + $0x198] sm:$0xff]   ;;  %v1094_v55 = vld [vmem:[%s1381_s1 + $0x120] sm:$0xff]   ;;  %v1098_v59 = vld [vmem:[%s1381_s1 + $0x128] sm:$0xff]  }
  0x13   :  { %931 = vmatpush3.bf16.msra.mxu0 %v1058_v17  ;;  %v1095_v56 = vld [vmem:[%s1381_s1 + $0x1e0] sm:$0xff]   ;;  %v1099_v60 = vld [vmem:[%s1381_s1 + $0x1e8] sm:$0xff]   ;;  %v1101_v62 = vld [vmem:[%s1381_s1 + $0x170] sm:$0xff]  }
  0x14   :  { %932 = vmatprep.subr.bf16.mxu0 %v1061_v20  ;;  %v1096_v57 = vld [vmem:[%s1381_s1 + $0x1a0] sm:$0xff]   ;;  %v1100_v61 = vld [vmem:[%s1381_s1 + $0x1a8] sm:$0xff]   ;;  %v1102_v63 = vld [vmem:[%s1381_s1 + $0x130] sm:$0xff]  }
  0x15   :  { %953 = vmatpush3.bf16.msra.mxu1 %v1060_v19  ;;  %v1103_v0 = vld [vmem:[%s1381_s1 + $0x1f0] sm:$0xff]   ;;  %v1105_v2 = vld [vmem:[%s1381_s1 + $0x178] sm:$0xff]   ;;  %v1113_v13 = vld [vmem:[%s1381_s1 + $0x200] sm:$0xff]  }
  0x16   :  { %954 = vmatprep.subr.bf16.mxu1 %v1063_v22  ;;  %v1104_v1 = vld [vmem:[%s1381_s1 + $0x1b0] sm:$0xff]   ;;  %v1106_v3 = vld [vmem:[%s1381_s1 + $0x138] sm:$0xff]   ;;  %v1114_v14 = vld [vmem:[%s1381_s1 + $0x208] sm:$0xff]  }
  0x17   :  { %933 = vmatpush3.bf16.msra.mxu0 %v1062_v21  ;;  %v1107_v4 = vld [vmem:[%s1381_s1 + $0x1f8] sm:$0xff]   ;;  %v17_v5 = vld [vmem:[%s1382_s0 + $0x10] sm:$0xff]  ;;  %v1117_v17 = vld [vmem:[%s1381_s1 + $0x220] sm:$0xff]  }
  0x18   :  { %934 = vmatprep.subr.bf16.mxu0 %v1065_v24  ;;  %v845_v6 = vcombine.low %v17_v5, %v17_v5  ;;  %v846_v7 = vcombine.high %v17_v5, %v17_v5  ;;  %v1110_v8 = vld [vmem:[%s1381_s1 + $0x1b8] sm:$0xff]   ;;  %v1115_v15 = vld [vmem:[%s1381_s1 + $0x210] sm:$0xff]   ;;  %v1118_v18 = vld [vmem:[%s1381_s1 + $0x228] sm:$0xff]  }
  0x19   :  { %955 = vmatpush3.bf16.msra.mxu1 %v1064_v23  ;;  %v18_v10 = vld [vmem:[%s1382_s0 + $0x18] sm:$0xff]  ;;  %v1119_v19 = vld [vmem:[%s1381_s1 + $0x230] sm:$0xff]   ;;  %v1121_v21 = vld [vmem:[%s1382_s0 + $0x20] ss:$0 sps:$4 sm:$0xff]  }
  0x1a   :  { %956 = vmatprep.subr.bf16.mxu1 %v1067_v26  ;;  %v847_v11 = vcombine.low %v18_v10, %v18_v10  ;;  %v848_v12 = vcombine.high %v18_v10, %v18_v10  ;;  %v1116_v16 = vld [vmem:[%s1381_s1 + $0x218] sm:$0xff]   ;;  %v840_v23 = vld [vmem:[%s1383_s2] ss:$0 sm:$0xff] }
  0x1b   :  { %935 = vmatpush3.bf16.msra.mxu0 %v1066_v25  ;;  %v1120_v20 = vld [vmem:[%s1381_s1 + $0x238] sm:$0xff]  }
  0x1c   :  { %936 = vmatprep.subr.bf16.mxu0 %v1069_v28 }
  0x1d   :  { %957 = vmatpush3.bf16.msra.mxu1 %v1068_v27 }
  0x1e   :  { %958 = vmatprep.subr.bf16.mxu1 %v1071_v30 }
  0x1f   :  { %937 = vmatpush3.bf16.msra.mxu0 %v1070_v29 }
  0x20   :  { %966 = vmatprep.subr.bf16.mxu0 %v1075_v35 }
  0x21   :  { %959 = vmatpush3.bf16.msra.mxu1 %v1074_v34 }
  0x22   :  { %668 = vmatmul.mubr.bf16.vlgmr.msra.gmra.mrb[0].mxu0 %v841_v32  ;;  %988 = vmatprep.subr.bf16.mxu1 %v1079_v40 }
  0x23   :  { %967 = vmatpush3.bf16.msra.mxu0 %v1078_v39  ;;  %747 = vmatprep.mubr.bf16.mxu0 %v846_v7 }
  0x24   :  { %708 = vmatmul.mubr.bf16.vlgmr.msra.gmra.mrb[0].mxu1 %v843_v37  ;;  %968 = vmatprep.subr.bf16.mxu0 %v1081_v42 }
  0x25   :  { %989 = vmatpush3.bf16.msra.mxu1 %v1080_v41  ;;  %787 = vmatprep.mubr.bf16.mxu1 %v848_v12 }
  0x26   :  { %990 = vmatprep.subr.bf16.mxu1 %v1083_v44 }
  0x27   :  { %969 = vmatpush3.bf16.msra.mxu0 %v1082_v43 }
  0x28   :  { %970 = vmatprep.subr.bf16.mxu0 %v1085_v46 }
  0x29   :  { %991 = vmatpush3.bf16.msra.mxu1 %v1084_v45 }
  0x2a   :  { %992 = vmatprep.subr.bf16.mxu1 %v1087_v48 }
  0x2b   :  { %971 = vmatpush3.bf16.msra.mxu0 %v1086_v47 }
  0x2c   :  { %972 = vmatprep.subr.bf16.mxu0 %v1089_v50 }
  0x2d   :  { %993 = vmatpush3.bf16.msra.mxu1 %v1088_v49 }
  0x2e   :  { %994 = vmatprep.subr.bf16.mxu1 %v1091_v52 }
  0x2f   :  { %973 = vmatpush3.bf16.msra.mxu0 %v1090_v51 }
  0x30   :  { %974 = vmatprep.subr.bf16.mxu0 %v1093_v54 }
  0x31   :  { %995 = vmatpush3.bf16.msra.mxu1 %v1092_v53 }
  0x32   :  { %996 = vmatprep.subr.bf16.mxu1 %v1095_v56 }
  0x33   :  { %975 = vmatpush3.bf16.msra.mxu0 %v1094_v55 }
  0x34   :  { %976 = vmatprep.subr.bf16.mxu0 %v1097_v58 }
  0x35   :  { %997 = vmatpush3.bf16.msra.mxu1 %v1096_v57 }
  0x36   :  { %998 = vmatprep.subr.bf16.mxu1 %v1099_v60 }
  0x37   :  { %977 = vmatpush3.bf16.msra.mxu0 %v1098_v59 }
  0x38   :  { %978 = vmatprep.subr.bf16.mxu0 %v1101_v62 }
  0x39   :  { %999 = vmatpush3.bf16.msra.mxu1 %v1100_v61 }
  0x3a   :  { %1000 = vmatprep.subr.bf16.mxu1 %v1103_v0 }
  0x3b   :  { %979 = vmatpush3.bf16.msra.mxu0 %v1102_v63 }
  0x3c   :  { %980 = vmatprep.subr.bf16.mxu0 %v1105_v2 }
  0x3d   :  { %1001 = vmatpush3.bf16.msra.mxu1 %v1104_v1 }
  0x3e   :  { %1002 = vmatprep.subr.bf16.mxu1 %v1107_v4 }
  0x3f   :  { %981 = vmatpush3.bf16.msra.mxu0 %v1106_v3 }
  0x40   :  { %1019 = vmatprep.subr.bf16.mxu0 %v1122_v9 }
  0x41   :  { %1003 = vmatpush3.bf16.msra.mxu1 %v1110_v8 }
  0x42   :  { %748 = vmatmul.mubr.bf16.vlgmr.msra.gmra.mrb[4].mxu0 %v845_v6 }
  0x43   :  { %1020 = vmatpush3.bf16.msra.mxu0 %v1113_v13  ;;  %1035 = vmatprep.mubr.msk.bf16.mxu0 %vm1123_vm0, %v1122_v9 }
  0x44   :  { %788 = vmatmul.mubr.bf16.vlgmr.msra.gmra.mrb[4].mxu1 %v847_v11  ;;  %1021 = vmatprep.subr.bf16.mxu0 %v1122_v9 }
  0x47   :  { %1022 = vmatpush3.bf16.msra.mxu0 %v1114_v14 }
  0x48   :  { %1023 = vmatprep.subr.bf16.mxu0 %v1122_v9 }
  0x4b   :  { %1024 = vmatpush3.bf16.msra.mxu0 %v1115_v15 }
  0x4c   :  { %1025 = vmatprep.subr.bf16.mxu0 %v1122_v9 }
  0x4f   :  { %1026 = vmatpush3.bf16.msra.mxu0 %v1116_v16 }
  0x50   :  { %1027 = vmatprep.subr.bf16.mxu0 %v1122_v9 }
  0x53   :  { %1028 = vmatpush3.bf16.msra.mxu0 %v1117_v17 }
  0x54   :  { %1029 = vmatprep.subr.bf16.mxu0 %v1122_v9 }
  0x57   :  { %1030 = vmatpush3.bf16.msra.mxu0 %v1118_v18 }
  0x58   :  { %1031 = vmatprep.subr.bf16.mxu0 %v1122_v9 }
  0x5b   :  { %1032 = vmatpush3.bf16.msra.mxu0 %v1119_v19 }
  0x5c   :  { %1033 = vmatprep.subr.bf16.mxu0 %v1122_v9 }
  0x5f   :  { %1034 = vmatpush3.bf16.msra.mxu0 %v1120_v20 }
  0x62   :  { %1036 = vmatmul.mubr.bf16.vlgmr.msra.gmra.mrb[8].mxu0 %v1121_v21 }
  0xf5   :  { %v938_v22 = vpop.f32.mrb[0].mxu0 }
  0xf6   :  { %v939_v24 = vpop.f32.mrb[1].mxu0 }
  0xf7   :  { %v940_v25 = vadd.f32 %v939_v24, %v938_v22  ;;  %v941_v26 = vpop.f32.mrb[2].mxu0  ;;  %v960_v27 = vpop.f32.mrb[0].mxu1 }
  0xf8   :  { %v942_v28 = vpop.f32.mrb[3].mxu0  ;;  %v961_v29 = vpop.f32.mrb[1].mxu1 }
  0xf9   :  { %v670_v30 = vadd.f32 %v940_v25, %v840_v23  ;;  %v962_v31 = vadd.f32 %v961_v29, %v960_v27  ;;  %v963_v32 = vpop.f32.mrb[2].mxu1 }
  0xfa   :  { %v964_v33 = vpop.f32.mrb[3].mxu1 }
  0xfb   :  { %v710_v34 = vadd.f32 %v962_v31, %v670_v30 }
 0x115   :  { %v982_v35 = vpop.f32.mrb[4].mxu0 }
 0x116   :  { %v983_v36 = vpop.f32.mrb[5].mxu0 }
 0x117   :  { %v984_v37 = vadd.f32 %v983_v36, %v982_v35  ;;  %v985_v38 = vpop.f32.mrb[6].mxu0  ;;  %v1004_v39 = vpop.f32.mrb[4].mxu1 }
 0x118   :  { %v986_v40 = vpop.f32.mrb[7].mxu0  ;;  %v1005_v41 = vpop.f32.mrb[5].mxu1 }
 0x119   :  { %v750_v42 = vadd.f32 %v984_v37, %v710_v34  ;;  %v1006_v43 = vadd.f32 %v1005_v41, %v1004_v39  ;;  %v1007_v44 = vpop.f32.mrb[6].mxu1 }
 0x11a   :  { %v1008_v45 = vpop.f32.mrb[7].mxu1 }
 0x11b   :  { %v790_v46 = vadd.f32 %v1006_v43, %v750_v42 }
 0x135   :  { %v829_v47 = vpop.f32.mrb[8].mxu0 }
 0x136   :  { %v830_v48 = vadd.f32 %v829_v47, %v790_v46  ;;  %v1037_v49 = vpop.f32.mrb[9].mxu0 }
 0x137   :  { %v832_v50 = vpop.f32.mrb[10].mxu0 }
 0x138   :  { %835 = vst [vmem:[%s1384_s3] sm:$0xff] %v830_v48  ;;  %v1038_v51 = vpop.f32.mrb[11].mxu0 }

</bundles_post_ra>
